<compile_context>
chip_gen: v7x
topology: tpu7x:2x2x1
jax: 0.10.0
libtpu: 0.0.40
codegen_flags: <defaults>
</compile_context>

<pallas_src>
import functools

import jax
import jax.numpy as jnp
from jax import lax
from jax.experimental import pallas as pl
from jax.experimental.pallas import tpu as pltpu


def _round_up(x, m):
    return ((x + m - 1) // m) * m


def _cdiv(a, b):
    return (a + b - 1) // b


def _linear_kernel_single(x_ref, w_ref, b_ref, o_ref):
    """Whole-K linear tile: o = x @ W + b (no scratch accumulator needed)."""
    o_ref[...] = (
        jnp.dot(x_ref[...], w_ref[...], preferred_element_type=jnp.float32)
        + b_ref[...].astype(jnp.float32)
    ).astype(o_ref.dtype)


def _linear_kernel_multi(x_ref, w_ref, b_ref, o_ref, acc_ref, *,
                         k_total, tk, mask_k):
    """K-tiled linear, accumulating over the innermost ('arbitrary') grid axis.

    x_ref:   (tm, tk)  activation tile (may be partial in M and/or K)
    w_ref:   (tk, tn)  weight tile, pre-transposed to (K, N) and zero-padded
    b_ref:   (1,  tn)  bias tile (zero-padded)
    o_ref:   (tm, tn)  output tile
    acc_ref: (tm, tn)  f32 accumulator (VMEM scratch, resident across K steps)
    """
    k = pl.program_id(2)

    @pl.when(k == 0)
    def _():
        # Fold the bias into the accumulator init (saves a separate VPU pass).
        acc_ref[...] = jnp.broadcast_to(b_ref[...].astype(jnp.float32),
                                        acc_ref.shape)

    x = x_ref[...]
    if mask_k:
        # K is not a multiple of tk: the last K block extends past the real
        # array and its tail holds stale VMEM.  Zero it so garbage (possibly
        # NaN/Inf) never poisons the accumulator.  For k < last the predicate
        # is all-true, so this is a cheap VPU select.
        col = lax.broadcasted_iota(jnp.int32, x.shape, 1)
        x = jnp.where(col < (k_total - k * tk), x, jnp.zeros_like(x))

    acc_ref[...] += jnp.dot(x, w_ref[...], preferred_element_type=jnp.float32)

    @pl.when(k == pl.num_programs(2) - 1)
    def _():
        o_ref[...] = acc_ref[...].astype(o_ref.dtype)


@functools.partial(jax.jit, static_argnames=("tm_max", "tk_max", "tn_max"))
def logistic_regression_bottom(x, weight, bias, *,
                               tm_max=512, tk_max=2048, tn_max=512):
    """Forward pass of LogisticRegressionBottom.

    x:      (B, num_input)            float32
    weight: (num_output, num_input)   float32  (PyTorch nn.Linear convention)
    bias:   (num_output,)             float32
    returns (B, num_output)           float32
    """
    B, K = x.shape
    N, K_w = weight.shape
    if K != K_w:
        raise ValueError(f"shape mismatch: x {x.shape} vs weight {weight.shape}")

    # ---------------- tile sizes (lane/sublane aligned) --------------------
    tm = min(tm_max, _round_up(B, 8))
    tn = min(tn_max, _round_up(N, 128))
    Np = _round_up(N, tn)
    grid_n = Np // tn

    single_k = _round_up(K, 128) <= tk_max
    if single_k:
        tk = K                          # full-extent K block: no pad, no mask
        grid_k = 1
    else:
        tk = tk_max
        grid_k = _cdiv(K, tk)

    grid_m = _cdiv(B, tm)
    # v7x has 2 TensorCores: ensure the parallel part of the grid has >= 2
    # blocks whenever B allows it (neutral on single-TC v5e/v6e).
    if grid_m * grid_n < 2:
        tm_half = _round_up(_cdiv(B, 2), 8)
        if _cdiv(B, tm_half) >= 2:
            tm = tm_half
            grid_m = _cdiv(B, tm)

    # Generation-aware VMEM budget (v7x only has 64 MiB per TensorCore).
    try:
        vmem_cap = int(pltpu.get_tpu_info().vmem_capacity_bytes)
        if vmem_cap <= 0:
            vmem_cap = 64 * 1024 * 1024
    except Exception:
        vmem_cap = 64 * 1024 * 1024
    vmem_budget = int(0.75 * vmem_cap)

    def _footprint(tm_, tk_, tn_):
        # double-buffered x / W / bias / out tiles + f32 accumulator
        return 4 * (2 * tm_ * tk_ + 2 * tk_ * tn_ + 2 * tn_
                    + 2 * tm_ * tn_ + tm_ * tn_)

    # Defensive shrink (never triggers with the default maxes, but keeps
    # user-supplied tile maxes from blowing the scoped-VMEM budget).
    while (not single_k) and tk > 512 and _footprint(tm, tk, tn) > vmem_budget:
        tk //= 2
        grid_k = _cdiv(K, tk)
    while tm > 64 and _footprint(tm, tk, tn) > vmem_budget:
        tm = _round_up(tm // 2, 8)
        grid_m = _cdiv(B, tm)

    mask_k = (not single_k) and (K % tk != 0)
    Kp = K if single_k else grid_k * tk

    # ----------- operand prep: only the *small* weight/bias get copied -----
    # Pre-transpose W once so the contraction dim sits on the RHS sublane
    # axis; zero padding keeps the padded K rows / N columns inert.
    wt = weight.T                                   # (K, N)
    if (Kp, Np) != (K, N):
        wt = jnp.pad(wt, ((0, Kp - K), (0, Np - N)))
    b2d = bias.reshape(1, N)
    if Np != N:
        b2d = jnp.pad(b2d, ((0, 0), (0, Np - N)))
    # x is NOT padded: partial M-tail output rows are masked on store, and a
    # partial K block is zero-masked inside the kernel.

    cost = pl.CostEstimate(
        flops=2 * B * Kp * Np,
        transcendentals=0,
        bytes_accessed=4 * (B * K * grid_n + Kp * Np * grid_m + B * Np + Np))

    if single_k:
        grid = (grid_m, grid_n)
        in_specs = [
            pl.BlockSpec((tm, tk), lambda i, j: (i, 0)),     # x
            pl.BlockSpec((tk, tn), lambda i, j: (0, j)),     # W.T (padded)
            pl.BlockSpec((1, tn), lambda i, j: (0, j)),      # bias
        ]
        out_specs = pl.BlockSpec((tm, tn), lambda i, j: (i, j))
        scratch_shapes = ()
        kernel = _linear_kernel_single
        dims = ("parallel", "parallel")
    else:
        grid = (grid_m, grid_n, grid_k)
        in_specs = [
            pl.BlockSpec((tm, tk), lambda i, j, k: (i, k)),  # x
            pl.BlockSpec((tk, tn), lambda i, j, k: (k, j)),  # W.T (padded)
            pl.BlockSpec((1, tn), lambda i, j, k: (0, j)),   # bias
        ]
        out_specs = pl.BlockSpec((tm, tn), lambda i, j, k: (i, j))
        scratch_shapes = (pltpu.VMEM((tm, tn), jnp.float32),)
        kernel = functools.partial(_linear_kernel_multi,
                                   k_total=K, tk=tk, mask_k=mask_k)
        dims = ("parallel", "parallel", "arbitrary")

    out_padded = pl.pallas_call(
        kernel,
        out_shape=jax.ShapeDtypeStruct((B, Np), x.dtype),
        grid_spec=pltpu.PrefetchScalarGridSpec(
            num_scalar_prefetch=0,
            grid=grid,
            in_specs=in_specs,
            out_specs=out_specs,
            scratch_shapes=scratch_shapes,
        ),
        compiler_params=pltpu.CompilerParams(
            dimension_semantics=dims,
            vmem_limit_bytes=vmem_budget),
        cost_estimate=cost,
    )(x, wt, b2d)

    if Np != N:
        return out_padded[:, :N]
    return out_padded


if __name__ == "__main__":
    # ---- Small shapes consistent with the module: batch=2, in=32, out=8 ----
    batch, num_input, num_output = 2, 32, 8
    key = jax.random.PRNGKey(0)
    k_x, k_w, k_b = jax.random.split(key, 3)

    bound = 1.0 / (num_input ** 0.5)
    x = jax.random.normal(k_x, (batch, num_input), dtype=jnp.float32)
    weight = jax.random.uniform(k_w, (num_output, num_input),
                                minval=-bound, maxval=bound, dtype=jnp.float32)
    bias = jax.random.uniform(k_b, (num_output,),
                              minval=-bound, maxval=bound, dtype=jnp.float32)

    out = jax.block_until_ready(logistic_regression_bottom(x, weight, bias))
    ref = x @ weight.T + bias
    assert out.shape == (batch, num_output)
    assert jnp.allclose(out, ref, atol=1e-5, rtol=1e-5)

    # ---- Single-K path with several M blocks (megacore split, no x pad) ----
    B2, K2, N2 = 512, 1024, 8
    k_x2, k_w2, k_b2 = jax.random.split(jax.random.PRNGKey(1), 3)
    bound2 = 1.0 / (K2 ** 0.5)
    x2 = jax.random.normal(k_x2, (B2, K2), dtype=jnp.float32)
    w2 = jax.random.uniform(k_w2, (N2, K2),
                            minval=-bound2, maxval=bound2, dtype=jnp.float32)
    b2 = jax.random.uniform(k_b2, (N2,),
                            minval=-bound2, maxval=bound2, dtype=jnp.float32)

    out2 = jax.block_until_ready(logistic_regression_bottom(x2, w2, b2))
    ref2 = x2 @ w2.T + b2
    assert out2.shape == (B2, N2)
    assert jnp.allclose(out2, ref2, atol=2e-3, rtol=2e-3)

    # ---- Multi-K path: unaligned B/K/N exercising the in-kernel K mask ----
    B3, K3, N3 = 260, 2500, 10
    k_x3, k_w3, k_b3 = jax.random.split(jax.random.PRNGKey(2), 3)
    bound3 = 1.0 / (K3 ** 0.5)
    x3 = jax.random.normal(k_x3, (B3, K3), dtype=jnp.float32)
    w3 = jax.random.uniform(k_w3, (N3, K3),
                            minval=-bound3, maxval=bound3, dtype=jnp.float32)
    b3 = jax.random.uniform(k_b3, (N3,),
                            minval=-bound3, maxval=bound3, dtype=jnp.float32)

    out3 = jax.block_until_ready(logistic_regression_bottom(x3, w3, b3))
    ref3 = x3 @ w3.T + b3
    assert out3.shape == (B3, N3)
    assert jnp.allclose(out3, ref3, atol=5e-3, rtol=5e-3)

    print("KERNEL_OK")
</pallas_src>

<mosaic_0001>
module attributes {stable_mosaic.version = 11 : i64} {
  func.func @_linear_kernel_single(%arg0: i32, %arg1: i32, %arg2: memref<8x32xf32, #tpu.memory_space<vmem>>, %arg3: memref<32x128xf32, #tpu.memory_space<vmem>>, %arg4: memref<1x128xf32, #tpu.memory_space<vmem>>, %arg5: memref<8x128xf32, #tpu.memory_space<vmem>>) attributes {dimension_semantics = [#tpu.dimension_semantics<parallel>, #tpu.dimension_semantics<parallel>], iteration_bounds = array<i64: 1, 1>, scalar_prefetch = 0 : i64, scratch_operands = 0 : i64, tpu.core_type = #tpu.core_type<tc>, window_params = [{transform_indices = @transform_0, window_bounds = array<i64: 8, 32>}, {transform_indices = @transform_1, window_bounds = array<i64: 32, 128>}, {transform_indices = @transform_2, window_bounds = array<i64: 1, 128>}, {transform_indices = @transform_3, window_bounds = array<i64: 8, 128>}]} {
    %c0 = arith.constant 0 : index
    %c0_0 = arith.constant 0 : index
    %0 = vector.load %arg2[%c0, %c0_0] : memref<8x32xf32, #tpu.memory_space<vmem>>, vector<8x32xf32>
    %c0_1 = arith.constant 0 : index
    %c0_2 = arith.constant 0 : index
    %1 = vector.load %arg3[%c0_1, %c0_2] : memref<32x128xf32, #tpu.memory_space<vmem>>, vector<32x128xf32>
    %cst = arith.constant dense<0.000000e+00> : vector<8x128xf32>
    %2 = tpu.matmul %0, %1, %cst {dimension_numbers = #tpu.dot_dimension_numbers<[1], [0], [0], [1], [0, 0, 1, 1], [], []>} : vector<8x32xf32>, vector<32x128xf32>, vector<8x128xf32> -> vector<8x128xf32>
    %c0_3 = arith.constant 0 : index
    %c0_4 = arith.constant 0 : index
    %3 = vector.load %arg4[%c0_3, %c0_4] : memref<1x128xf32, #tpu.memory_space<vmem>>, vector<1x128xf32>
    %4 = vector.broadcast %3 : vector<1x128xf32> to vector<8x128xf32>
    %5 = arith.addf %2, %4 : vector<8x128xf32>
    %c0_5 = arith.constant 0 : index
    %c0_6 = arith.constant 0 : index
    %6 = vector.load %arg5[%c0_5, %c0_6] : memref<8x128xf32, #tpu.memory_space<vmem>>, vector<8x128xf32>
    tpu.vector_store %arg5[%c0_5, %c0_6], %5 {strides = array<i32>} : memref<8x128xf32, #tpu.memory_space<vmem>>, vector<8x128xf32>,
    return
  }
  func.func @transform_0(%arg0: i32, %arg1: i32) -> (i32, i32) {
    %c0_i32 = arith.constant 0 : i32
    %c0_i32_0 = arith.constant 0 : i32
    return %arg0, %c0_i32 : i32, i32
  }
  func.func @transform_1(%arg0: i32, %arg1: i32) -> (i32, i32) {
    %c0_i32 = arith.constant 0 : i32
    %c0_i32_0 = arith.constant 0 : i32
    return %c0_i32, %arg1 : i32, i32
  }
  func.func @transform_2(%arg0: i32, %arg1: i32) -> (i32, i32) {
    %c0_i32 = arith.constant 0 : i32
    %c0_i32_0 = arith.constant 0 : i32
    return %c0_i32, %arg1 : i32, i32
  }
  func.func @transform_3(%arg0: i32, %arg1: i32) -> (i32, i32) {
    %c0_i32 = arith.constant 0 : i32
    return %arg0, %arg1 : i32, i32
  }
}

</mosaic_0001>

<bundles_post_ra>
// kernel: logistic_regression_bottom.1
= control target key start
LH: loop header
LB: loop body
LE: loop exit
PB: predicated region body
PF: predicated region fallthrough
CT: control target
= control target key end

     0   :  { %8 = vsyncpa [#allocation3], 0  ;;  %v172_v2 = vmov 0.0|0.0   ;;  %vm173_vm0 = vmmov 0   ;;  %v174_v6 = vmov 0.0   ;;  %vm27_vm1 = vcmask 261120   ;;  %s228_s0 = inlined_call_operand.vmem [shape: f32[2,32], index: 0, kind: input, shape index: {}]   ;;  %s229_s1 = inlined_call_operand.vmem [shape: f32[32,128], index: 1, kind: input, shape index: {}]   ;;  %s230_s2 = inlined_call_operand.vmem [shape: f32[1,128], index: 2, kind: input, shape index: {}]   ;;  %s231_s3 = inlined_call_operand.hbm [shape: f32[2,128], index: 3, kind: output, shape index: {}]  }
   0x1   :  { %v16_v0 = vld [vmem:[%s229_s1] sm:$0xff]  ;;  %v17_v1 = vld [vmem:[%s229_s1 + $0x8] sm:$0xff]  ;;  %136 = vmatprep.subr.bf16.mxu0 %v172_v2  ;;  %v18_v4 = vld [vmem:[%s229_s1 + $0x10] sm:$0xff]  ;;  %133 = vmatprep.mubr.msk.f32.mxu0 %vm173_vm0, %v174_v6 }
   0x2   :  { %v137_v3 = vpack.c.bf16 %v17_v1, %v16_v0  ;;  %v19_v5 = vld [vmem:[%s229_s1 + $0x18] sm:$0xff]  ;;  %v15_v8 = vld [vmem:[%s228_s0] sm:$0xff] }
   0x3   :  { %v140_v7 = vpack.c.bf16 %v19_v5, %v18_v4  ;;  %v118_v9 = vld [vmem:[%s230_s2] ss:$0 sm:$0xff] }
   0x4   :  { %138 = vmatpush3.bf16.msra.mxu0 %v137_v3 }
   0x5   :  { %139 = vmatprep.subr.bf16.mxu0 %v172_v2 }
   0x8   :  { %141 = vmatpush3.bf16.msra.mxu0 %v140_v7 }
   0xb   :  { %134 = vmatmul.mubr.msk.f32.vlgmr.msra.gmra.mrb[0].mxu0 %vm27_vm1, %v15_v8 }
  0xde   :  { %v97_v10 = vpop.f32.mrb[0].mxu0 }
  0xdf   :  { %v98_v11 = vadd.f32 %v118_v9, %v97_v10  ;;  %v135_v12 = vpop.f32.mrb[1].mxu0 }
  0xe1   :  { %101 = vst [vmem:[#allocation2] sm:$0xff] %v98_v11 }
  0xe2   :  { %106 = vsyncadd [#allocation3], 96  ;;  %s175_s1 = smov [#allocation2]  }
  0xe3   :  { %s107_s24 = sshll.u32 %s175_s1, 4  ;;  %s108_s24 = int_to_ptr.vmem [resolvable:$true] %s107_s24 }
  0xe4   :  { %s148_s25 = scalar_lea.vmem %s108_s24, 32  ;;  %s152_s26 = scalar_lea.vmem %s108_s24, 128 }
  0xe5   :  { %p149_p0 = scmp.ne.s32.totalorder %s108_s24, %s148_s25  ;;  %p153_p1 = scmp.lt.s32.totalorder %s108_s24, %s108_s24 }
  0xe6   :  { %p154_p2 = scmp.lt.s32.totalorder %s152_s26, %s148_s25 }
  0xe8   :  { %p155_p3 = por %p154_p2, %p153_p1 }
  0xea   :  { %p156_p4 = pnand %p155_p3, %p149_p0 }
  0xec   :  { %159 = shalt.err (!%p156_p4)
}
  0xed   :  { %s160_s2 = scalar_lea.hbm %s231_s3, 32 }
  0xee   :  { %p161_p5 = scmp.ne.s32.totalorder %s231_s3, %s160_s2  ;;  %p164_p6 = scmp.lt.u32.totalorder %s160_s2, %s231_s3 }
  0xf0   :  { %p166_p7 = pnand %p164_p6, %p161_p5 }
  0xf2   :  { %169 = shalt.err (!%p166_p7)
}
  0xf3   :  { %s176_s5 = smov 32   ;;  %s177_s6 = smov 2  }
  0xf4   :  { %113 = dma.vmem_to_hbm [thread:$0]  %s108_s24, 32, %s231_s3, [#allocation3], %s176_s5, %s176_s5, %s177_s6  }
  0xf5   :  { %170 = dma.done.wait [#allocation3], 128  }
  0xf6   :  { %171 = vsyncadd [#allocation3], 4294967168 }
  0xf7   :  { %117 = vsyncpa [#allocation3], 1 }

</bundles_post_ra>
